<compile_context>
chip_gen: v6e
topology: v6e:2x2x1
jax: 0.10.0
libtpu: 0.0.40
codegen_flags: <defaults>
</compile_context>

<pallas_src>
import jax
import jax.numpy as jnp
from jax import lax
from jax.experimental import pallas as pl
from jax.experimental.pallas import tpu as pltpu

_LANE = 128


def _cdiv(a: int, b: int) -> int:
    return -(-a // b)


def _round_up(x: int, m: int) -> int:
    return _cdiv(x, m) * m


def _sublane_multiple(dtype) -> int:
    # Sub-32-bit dtypes pack along sublanes: f32 -> 8, bf16 -> 16, int8/fp8 -> 32.
    return 32 // jnp.dtype(dtype).itemsize


def _make_flash_kernel(*, tki, tko, n_chunks, kv_len, need_kv_mask, mm_dtype):
    def kernel(q_ref, k_ref, v_ref, inv_ref, o_ref, qs_sc, m_sc, l_sc, acc_sc):
        # Blocks (leading batch dim squeezed): q/o (tq, D), k/v (tko, D), inv (tq, 1).
        # Grid = (batch, q-tile, kv-outer); kv-outer must stay the innermost
        # ("arbitrary") axis for the scratch accumulators to be correct.
        ko = pl.program_id(2)

        @pl.when(ko == 0)
        def _init():
            m_sc[...] = jnp.full_like(m_sc, -jnp.inf)
            l_sc[...] = jnp.zeros_like(l_sc)
            acc_sc[...] = jnp.zeros_like(acc_sc)
            # Hoisted row scale: scaled = qk / inv_scale_factor is applied once per
            # q tile by folding r = 1/inv into Q (exact reciprocal; differs from a
            # per-score divide only at the ulp level).
            r = pl.reciprocal(inv_ref[...].astype(jnp.float32), approx=False)
            qs_sc[...] = (q_ref[...].astype(jnp.float32) * r).astype(qs_sc.dtype)

        q = qs_sc[...]                                   # (tq, D) in mm_dtype

        def chunk(j, carry):
            m_prev, l_prev, acc_prev = carry
            start = j * tki
            if not isinstance(start, int):
                start = pl.multiple_of(start, tki)
            k = k_ref[pl.ds(start, tki), :].astype(mm_dtype)   # (tki, D)
            v = v_ref[pl.ds(start, tki), :]                    # (tki, D)
            # s = Q @ K^T as a contraction over D: K feeds the MXU as the
            # transposed operand directly (no XLU transpose / VMEM temp).
            s = lax.dot_general(q, k, dimension_numbers=(((1,), (1,)), ((), ())),
                                preferred_element_type=jnp.float32)  # (tq, tki)
            if need_kv_mask:
                col = (ko * tko + start
                       + lax.broadcasted_iota(jnp.int32, (1, tki), 1))
                s = jnp.where(col < kv_len, s, -jnp.inf)
            m_new = jnp.maximum(m_prev, jnp.max(s, axis=-1, keepdims=True))
            alpha = jnp.exp(m_prev - m_new)
            p = jnp.exp(s - m_new)                                # (tq, tki)
            l_new = alpha * l_prev + jnp.sum(p, axis=-1, keepdims=True)
            acc_new = alpha * acc_prev + jnp.dot(
                p.astype(mm_dtype), v.astype(mm_dtype),
                preferred_element_type=jnp.float32)
            return m_new, l_new, acc_new

        carry = (m_sc[...], l_sc[...], acc_sc[...])
        if n_chunks == 1:
            carry = chunk(0, carry)
        else:
            carry = lax.fori_loop(0, n_chunks, chunk, carry, unroll=n_chunks <= 8)
        m_sc[...], l_sc[...], acc_sc[...] = carry

        # TODO(synk): F.dropout with a tensor-valued p is invalid in PyTorch; it is
        # treated as eval-mode dropout (identity) here for determinism.

        @pl.when(ko == pl.num_programs(2) - 1)
        def _finalize():
            o_ref[...] = (acc_sc[...] * pl.reciprocal(l_sc[...], approx=False)
                          ).astype(o_ref.dtype)

    return kernel


def attention(query, key, value, inv_scale_factor, dropout_p=None, *,
              q_tile=256, kv_tile=512, use_bf16_matmul=False,
              kv_resident_budget_bytes=None, vmem_limit_bytes=None):
    """softmax((Q @ K^T) / inv_scale_factor) @ V  (dropout treated as identity)."""
    del dropout_p  # identity (see TODO in kernel)
    B, S, D = query.shape
    dtype = query.dtype
    itemsize = jnp.dtype(dtype).itemsize
    sub = _sublane_multiple(dtype)
    # Optional bf16 MXU operands (f32 accumulation) for f32 inputs; off by default
    # to keep reference-level rounding.
    mm_dtype = jnp.bfloat16 if (use_bf16_matmul and dtype == jnp.float32) else dtype
    mm_itemsize = jnp.dtype(mm_dtype).itemsize

    # --- generation-aware VMEM budgeting (v5e/v6e: 128 MiB, v7x: 64 MiB per TC) ---
    try:
        vmem_cap = int(getattr(pltpu.get_tpu_info(), "vmem_capacity_bytes", 64 << 20))
    except Exception:
        vmem_cap = 64 << 20      # conservative (v7x-sized) fallback
    if kv_resident_budget_bytes is None:
        kv_resident_budget_bytes = min(24 << 20, vmem_cap // 4)

    # --- q tile: sublane-aligned; keep >= 2 parallel grid blocks when B == 1 so
    #     both v7x TensorCores get work -------------------------------------------
    tq = _round_up(min(q_tile, _round_up(S, sub)), sub)
    if B == 1:
        while _cdiv(S, tq) < 2 and tq // 2 >= sub:
            tq = _round_up(tq // 2, sub)
    s_pad_q = _round_up(S, tq)
    q_tiles = s_pad_q // tq

    # --- kv tiles: lane-dense (128-multiple) score tiles; K/V kept VMEM-resident
    #     per batch whenever they fit the budget ----------------------------------
    if S < _LANE:
        # Tiny sequences: full-length tile (avoids padding far past the data).
        tki = tko = _round_up(S, sub)
    else:
        s_pad_k = _round_up(S, _LANE)
        kv_tile_eff = max(_LANE, (min(kv_tile, 1024) // _LANE) * _LANE)
        tki = _LANE
        for cand in (1024, 512, 384, 256, 128):
            if cand <= min(kv_tile_eff, s_pad_k) and s_pad_k % cand == 0:
                tki = cand
                break
        kv_row_bytes = 4 * D * itemsize          # K + V, double-buffered, per row
        if kv_row_bytes * s_pad_k <= kv_resident_budget_bytes:
            tko = s_pad_k                        # fully resident per batch
        else:
            n_total = s_pad_k // tki
            m = max(1, (kv_resident_budget_bytes // kv_row_bytes) // tki)
            m = min(m, n_total)
            while n_total % m != 0:
                m -= 1
            tko = m * tki
    n_chunks = tko // tki
    s_pad_k = _round_up(S, tko)
    kv_outer = s_pad_k // tko
    need_kv_mask = s_pad_k != S

    if vmem_limit_bytes is None:
        need = (4 * tko * D * itemsize            # K, V blocks (double-buffered)
                + 4 * tq * D * itemsize           # Q + O blocks (double-buffered)
                + 4 * tq * itemsize               # inv block
                + tq * D * (4 + mm_itemsize)      # acc + (q * 1/inv) scratch
                + 2 * tq * 4                      # m, l scratch
                + 4 * tq * tki * 4)               # score/prob temporaries headroom
        vmem_limit_bytes = int(max(32 << 20,
                                   min(need + (8 << 20), (vmem_cap * 3) // 4)))

    # --- pad sequences so tiles divide them exactly (padded kv columns are masked
    #     to -inf inside the kernel; padded q rows are sliced off at the end) ------
    def _pad_seq(x, new_len, fill):
        if new_len == x.shape[1]:
            return x
        return jnp.pad(x, ((0, 0), (0, new_len - x.shape[1]), (0, 0)),
                       constant_values=fill)

    q_p = _pad_seq(query, s_pad_q, 0.0)
    inv_p = _pad_seq(inv_scale_factor, s_pad_q, 1.0)   # 1.0 avoids inf reciprocals
    k_p = _pad_seq(key, s_pad_k, 0.0)
    v_p = _pad_seq(value, s_pad_k, 0.0)

    kernel = _make_flash_kernel(tki=tki, tko=tko, n_chunks=n_chunks, kv_len=S,
                                need_kv_mask=need_kv_mask, mm_dtype=mm_dtype)

    out = pl.pallas_call(
        kernel,
        out_shape=jax.ShapeDtypeStruct((B, s_pad_q, D), dtype),
        grid_spec=pltpu.PrefetchScalarGridSpec(
            num_scalar_prefetch=0,
            grid=(B, q_tiles, kv_outer),
            in_specs=[
                pl.BlockSpec((None, tq, D), lambda b, qi, ko: (b, qi, 0)),
                # K/V index maps ignore qi: with kv_outer == 1 the block index only
                # changes with the batch, so K/V are DMA'd once per batch and stay
                # resident in VMEM across all q tiles.
                pl.BlockSpec((None, tko, D), lambda b, qi, ko: (b, ko, 0)),
                pl.BlockSpec((None, tko, D), lambda b, qi, ko: (b, ko, 0)),
                pl.BlockSpec((None, tq, 1), lambda b, qi, ko: (b, qi, 0)),
            ],
            out_specs=pl.BlockSpec((None, tq, D), lambda b, qi, ko: (b, qi, 0)),
            scratch_shapes=[
                pltpu.VMEM((tq, D), mm_dtype),      # q * (1/inv), built once per q tile
                pltpu.VMEM((tq, 1), jnp.float32),   # running max  m
                pltpu.VMEM((tq, 1), jnp.float32),   # running sum  l
                pltpu.VMEM((tq, D), jnp.float32),   # running acc  (P @ V)
            ],
        ),
        compiler_params=pltpu.CompilerParams(
            # batch + q-tile shard across TensorCores (v7x megacore); kv-outer is the
            # sequential reduction axis and must stay innermost / "arbitrary".
            dimension_semantics=("parallel", "parallel", "arbitrary"),
            vmem_limit_bytes=vmem_limit_bytes,
        ),
    )(q_p, k_p, v_p, inv_p)

    return out[:, :S, :] if s_pad_q != S else out


def _reference(query, key, value, inv_scale_factor):
    qk = jnp.einsum("bqd,bkd->bqk", query, key, precision=lax.Precision.HIGHEST)
    scaled = qk / inv_scale_factor
    sm = jax.nn.softmax(scaled, axis=-1)
    return jnp.einsum("bqk,bkd->bqd", sm, value, precision=lax.Precision.HIGHEST)


def _check(out, ref, tol, name):
    assert out.shape == ref.shape, (name, out.shape, ref.shape)
    err = float(jnp.max(jnp.abs(out - ref)))
    assert jnp.allclose(out, ref, atol=tol, rtol=tol), (name, err)


if __name__ == "__main__":
    root = jax.random.PRNGKey(0)

    # 1) The exact module shapes: (1, 8, 16) with N(0,1) inv_scale_factor.
    kq, kk, kv, ks, kd = jax.random.split(root, 5)
    B, S, D = 1, 8, 16
    query = jax.random.normal(kq, (B, S, D), dtype=jnp.float32)
    key_t = jax.random.normal(kk, (B, S, D), dtype=jnp.float32)
    value = jax.random.normal(kv, (B, S, D), dtype=jnp.float32)
    inv_scale_factor = jax.random.normal(ks, (B, S, 1), dtype=jnp.float32)
    dropout_p = jax.random.normal(kd, (B, S, 1), dtype=jnp.float32)

    out = jax.block_until_ready(
        attention(query, key_t, value, inv_scale_factor, dropout_p))
    # Dividing by an ~N(0,1) inv_scale_factor amplifies ulp-level score
    # differences (true divide vs. fold-reciprocal-into-Q), so compare at 1e-3.
    _check(out, _reference(query, key_t, value, inv_scale_factor), 1e-3, "module")

    # 2) Padded / masked path: S=200 is not a lane multiple (kv padded to 256 and
    #    masked to -inf); inv kept away from zero so the check is numerically sharp.
    k1, k2, k3, k4, k5 = jax.random.split(jax.random.fold_in(root, 1), 5)
    B2, S2, D2 = 2, 200, 32
    q2 = jax.random.normal(k1, (B2, S2, D2), dtype=jnp.float32)
    kk2 = jax.random.normal(k2, (B2, S2, D2), dtype=jnp.float32)
    v2 = jax.random.normal(k3, (B2, S2, D2), dtype=jnp.float32)
    sign2 = jnp.where(jax.random.bernoulli(k5, 0.5, (B2, S2, 1)), 1.0, -1.0)
    inv2 = sign2 * jax.random.uniform(k4, (B2, S2, 1), minval=0.7, maxval=1.3)
    out2 = jax.block_until_ready(attention(q2, kk2, v2, inv2))
    _check(out2, _reference(q2, kk2, v2, inv2), 1e-3, "masked/padded")

    # 3) Multi-chunk in-kernel kv loop (n_chunks > 1) with 2 parallel q tiles.
    k1, k2, k3, k4 = jax.random.split(jax.random.fold_in(root, 2), 4)
    B3, S3, D3 = 1, 256, 64
    q3 = jax.random.normal(k1, (B3, S3, D3), dtype=jnp.float32)
    kk3 = jax.random.normal(k2, (B3, S3, D3), dtype=jnp.float32)
    v3 = jax.random.normal(k3, (B3, S3, D3), dtype=jnp.float32)
    inv3 = jax.random.uniform(k4, (B3, S3, 1), minval=0.7, maxval=1.3)
    out3 = jax.block_until_ready(attention(q3, kk3, v3, inv3, q_tile=128, kv_tile=128))
    _check(out3, _reference(q3, kk3, v3, inv3), 1e-3, "chunked kv")

    print("KERNEL_OK")
</pallas_src>

<mosaic_0001>
module attributes {stable_mosaic.version = 11 : i64} {
  func.func @kernel(%arg0: i32, %arg1: i32, %arg2: i32, %arg3: memref<1x8x16xf32, #tpu.memory_space<vmem>>, %arg4: memref<1x8x16xf32, #tpu.memory_space<vmem>>, %arg5: memref<1x8x16xf32, #tpu.memory_space<vmem>>, %arg6: memref<1x8x1xf32, #tpu.memory_space<vmem>>, %arg7: memref<1x8x16xf32, #tpu.memory_space<vmem>>, %arg8: memref<8x16xf32, #tpu.memory_space<vmem>>, %arg9: memref<8x1xf32, #tpu.memory_space<vmem>>, %arg10: memref<8x1xf32, #tpu.memory_space<vmem>>, %arg11: memref<8x16xf32, #tpu.memory_space<vmem>>) attributes {dimension_semantics = [#tpu.dimension_semantics<parallel>, #tpu.dimension_semantics<parallel>, #tpu.dimension_semantics<arbitrary>], iteration_bounds = array<i64: 1, 1, 1>, scalar_prefetch = 0 : i64, scratch_operands = 4 : i64, tpu.core_type = #tpu.core_type<tc>, window_params = [{transform_indices = @transform_0, window_bounds = array<i64: 1, 8, 16>}, {transform_indices = @transform_1, window_bounds = array<i64: 1, 8, 16>}, {transform_indices = @transform_2, window_bounds = array<i64: 1, 8, 16>}, {transform_indices = @transform_3, window_bounds = array<i64: 1, 8, 1>}, {transform_indices = @transform_4, window_bounds = array<i64: 1, 8, 16>}]} {
    %c0_i32 = arith.constant 0 : i32
    %0 = arith.cmpi eq, %arg2, %c0_i32 : i32
    %1 = arith.extui %0 : i1 to i32
    %c0_i32_0 = arith.constant 0 : i32
    %2 = arith.cmpi ne, %1, %c0_i32_0 : i32
    scf.if %2 {
      %cst_25 = arith.constant 0xFF800000 : f32
      %34 = vector.broadcast %cst_25 : f32 to vector<8x1xf32>
      %c0_26 = arith.constant 0 : index
      %c0_27 = arith.constant 0 : index
      %35 = vector.load %arg9[%c0_26, %c0_27] : memref<8x1xf32, #tpu.memory_space<vmem>>, vector<8x1xf32>
      tpu.vector_store %arg9[%c0_26, %c0_27], %34 {strides = array<i32>} : memref<8x1xf32, #tpu.memory_space<vmem>>, vector<8x1xf32>,
      %cst_28 = arith.constant 0.000000e+00 : f32
      %36 = vector.broadcast %cst_28 : f32 to vector<8x1xf32>
      %c0_29 = arith.constant 0 : index
      %c0_30 = arith.constant 0 : index
      %37 = vector.load %arg10[%c0_29, %c0_30] : memref<8x1xf32, #tpu.memory_space<vmem>>, vector<8x1xf32>
      tpu.vector_store %arg10[%c0_29, %c0_30], %36 {strides = array<i32>} : memref<8x1xf32, #tpu.memory_space<vmem>>, vector<8x1xf32>,
      %cst_31 = arith.constant 0.000000e+00 : f32
      %38 = vector.broadcast %cst_31 : f32 to vector<8x16xf32>
      %c0_32 = arith.constant 0 : index
      %c0_33 = arith.constant 0 : index
      %39 = vector.load %arg11[%c0_32, %c0_33] : memref<8x16xf32, #tpu.memory_space<vmem>>, vector<8x16xf32>
      tpu.vector_store %arg11[%c0_32, %c0_33], %38 {strides = array<i32>} : memref<8x16xf32, #tpu.memory_space<vmem>>, vector<8x16xf32>,
      %c0_34 = arith.constant 0 : index
      %c0_35 = arith.constant 0 : index
      %c0_36 = arith.constant 0 : index
      %40 = vector.load %arg6[%c0_34, %c0_35, %c0_36] : memref<1x8x1xf32, #tpu.memory_space<vmem>>, vector<1x8x1xf32>
      %41 = vector.shape_cast %40 : vector<1x8x1xf32> to vector<8x1xf32>
      %42 = tpu.reciprocal %41 : vector<8x1xf32> -> vector<8x1xf32>
      %c0_37 = arith.constant 0 : index
      %c0_38 = arith.constant 0 : index
      %c0_39 = arith.constant 0 : index
      %43 = vector.load %arg3[%c0_37, %c0_38, %c0_39] : memref<1x8x16xf32, #tpu.memory_space<vmem>>, vector<1x8x16xf32>
      %44 = vector.shape_cast %43 : vector<1x8x16xf32> to vector<8x16xf32>
      %45 = vector.broadcast %42 : vector<8x1xf32> to vector<8x16xf32>
      %46 = arith.mulf %44, %45 : vector<8x16xf32>
      %c0_40 = arith.constant 0 : index
      %c0_41 = arith.constant 0 : index
      %47 = vector.load %arg8[%c0_40, %c0_41] : memref<8x16xf32, #tpu.memory_space<vmem>>, vector<8x16xf32>
      tpu.vector_store %arg8[%c0_40, %c0_41], %46 {strides = array<i32>} : memref<8x16xf32, #tpu.memory_space<vmem>>, vector<8x16xf32>,
    } else {
    }
    %c0 = arith.constant 0 : index
    %c0_1 = arith.constant 0 : index
    %3 = vector.load %arg8[%c0, %c0_1] : memref<8x16xf32, #tpu.memory_space<vmem>>, vector<8x16xf32>
    %c0_2 = arith.constant 0 : index
    %c0_3 = arith.constant 0 : index
    %4 = vector.load %arg9[%c0_2, %c0_3] : memref<8x1xf32, #tpu.memory_space<vmem>>, vector<8x1xf32>
    %c0_4 = arith.constant 0 : index
    %c0_5 = arith.constant 0 : index
    %5 = vector.load %arg10[%c0_4, %c0_5] : memref<8x1xf32, #tpu.memory_space<vmem>>, vector<8x1xf32>
    %c0_6 = arith.constant 0 : index
    %c0_7 = arith.constant 0 : index
    %6 = vector.load %arg11[%c0_6, %c0_7] : memref<8x16xf32, #tpu.memory_space<vmem>>, vector<8x16xf32>
    %c0_8 = arith.constant 0 : index
    %c0_9 = arith.constant 0 : index
    %c0_10 = arith.constant 0 : index
    %7 = vector.load %arg4[%c0_8, %c0_9, %c0_10] : memref<1x8x16xf32, #tpu.memory_space<vmem>>, vector<1x8x16xf32>
    %8 = vector.shape_cast %7 : vector<1x8x16xf32> to vector<8x16xf32>
    %c0_11 = arith.constant 0 : index
    %c0_12 = arith.constant 0 : index
    %c0_13 = arith.constant 0 : index
    %9 = vector.load %arg5[%c0_11, %c0_12, %c0_13] : memref<1x8x16xf32, #tpu.memory_space<vmem>>, vector<1x8x16xf32>
    %10 = vector.shape_cast %9 : vector<1x8x16xf32> to vector<8x16xf32>
    %cst = arith.constant dense<0.000000e+00> : vector<8x8xf32>
    %11 = tpu.matmul %3, %8, %cst {dimension_numbers = #tpu.dot_dimension_numbers<[1], [1], [0], [0], [0, 0, 1, 0], [], []>} : vector<8x16xf32>, vector<8x16xf32>, vector<8x8xf32> -> vector<8x8xf32>
    %cst_14 = arith.constant dense<0xFF800000> : vector<8xf32>
    %12 = vector.multi_reduction <maximumf>, %11, %cst_14 [1] : vector<8x8xf32> to vector<8xf32>
    %13 = vector.shape_cast %12 : vector<8xf32> to vector<8x1xf32>
    %14 = arith.maximumf %4, %13 : vector<8x1xf32>
    %15 = arith.subf %4, %14 : vector<8x1xf32>
    %16 = math.exp %15 : vector<8x1xf32>
    %17 = vector.broadcast %14 : vector<8x1xf32> to vector<8x8xf32>
    %18 = arith.subf %11, %17 : vector<8x8xf32>
    %19 = math.exp %18 : vector<8x8xf32>
    %20 = arith.mulf %16, %5 : vector<8x1xf32>
    %cst_15 = arith.constant dense<0.000000e+00> : vector<8xf32>
    %21 = vector.multi_reduction <add>, %19, %cst_15 [1] : vector<8x8xf32> to vector<8xf32>
    %22 = vector.shape_cast %21 : vector<8xf32> to vector<8x1xf32>
    %23 = arith.addf %20, %22 : vector<8x1xf32>
    %24 = vector.broadcast %16 : vector<8x1xf32> to vector<8x16xf32>
    %25 = arith.mulf %24, %6 : vector<8x16xf32>
    %cst_16 = arith.constant dense<0.000000e+00> : vector<8x16xf32>
    %26 = tpu.matmul %19, %10, %cst_16 {dimension_numbers = #tpu.dot_dimension_numbers<[1], [0], [0], [1], [0, 0, 1, 1], [], []>} : vector<8x8xf32>, vector<8x16xf32>, vector<8x16xf32> -> vector<8x16xf32>
    %27 = arith.addf %25, %26 : vector<8x16xf32>
    %c0_17 = arith.constant 0 : index
    %c0_18 = arith.constant 0 : index
    %28 = vector.load %arg9[%c0_17, %c0_18] : memref<8x1xf32, #tpu.memory_space<vmem>>, vector<8x1xf32>
    tpu.vector_store %arg9[%c0_17, %c0_18], %14 {strides = array<i32>} : memref<8x1xf32, #tpu.memory_space<vmem>>, vector<8x1xf32>,
    %c0_19 = arith.constant 0 : index
    %c0_20 = arith.constant 0 : index
    %29 = vector.load %arg10[%c0_19, %c0_20] : memref<8x1xf32, #tpu.memory_space<vmem>>, vector<8x1xf32>
    tpu.vector_store %arg10[%c0_19, %c0_20], %23 {strides = array<i32>} : memref<8x1xf32, #tpu.memory_space<vmem>>, vector<8x1xf32>,
    %c0_21 = arith.constant 0 : index
    %c0_22 = arith.constant 0 : index
    %30 = vector.load %arg11[%c0_21, %c0_22] : memref<8x16xf32, #tpu.memory_space<vmem>>, vector<8x16xf32>
    tpu.vector_store %arg11[%c0_21, %c0_22], %27 {strides = array<i32>} : memref<8x16xf32, #tpu.memory_space<vmem>>, vector<8x16xf32>,
    %c0_i32_23 = arith.constant 0 : i32
    %31 = arith.cmpi eq, %arg2, %c0_i32_23 : i32
    %32 = arith.extui %31 : i1 to i32
    %c0_i32_24 = arith.constant 0 : i32
    %33 = arith.cmpi ne, %32, %c0_i32_24 : i32
    scf.if %33 {
      %c0_25 = arith.constant 0 : index
      %c0_26 = arith.constant 0 : index
      %34 = vector.load %arg11[%c0_25, %c0_26] : memref<8x16xf32, #tpu.memory_space<vmem>>, vector<8x16xf32>
      %c0_27 = arith.constant 0 : index
      %c0_28 = arith.constant 0 : index
      %35 = vector.load %arg10[%c0_27, %c0_28] : memref<8x1xf32, #tpu.memory_space<vmem>>, vector<8x1xf32>
      %36 = tpu.reciprocal %35 : vector<8x1xf32> -> vector<8x1xf32>
      %37 = vector.broadcast %36 : vector<8x1xf32> to vector<8x16xf32>
      %38 = arith.mulf %34, %37 : vector<8x16xf32>
      %c0_29 = arith.constant 0 : index
      %c0_30 = arith.constant 0 : index
      %c0_31 = arith.constant 0 : index
      %39 = vector.load %arg7[%c0_29, %c0_30, %c0_31] : memref<1x8x16xf32, #tpu.memory_space<vmem>>, vector<1x8x16xf32>
      %40 = vector.shape_cast %39 : vector<1x8x16xf32> to vector<8x16xf32>
      %41 = vector.shape_cast %38 : vector<8x16xf32> to vector<1x8x16xf32>
      tpu.vector_store %arg7[%c0_29, %c0_30, %c0_31], %41 {strides = array<i32>} : memref<1x8x16xf32, #tpu.memory_space<vmem>>, vector<1x8x16xf32>,
    } else {
    }
    return
  }
  func.func @transform_0(%arg0: i32, %arg1: i32, %arg2: i32) -> (i32, i32, i32) {
    %c0_i32 = arith.constant 0 : i32
    %c0_i32_0 = arith.constant 0 : i32
    return %arg0, %arg1, %c0_i32 : i32, i32, i32
  }
  func.func @transform_1(%arg0: i32, %arg1: i32, %arg2: i32) -> (i32, i32, i32) {
    %c0_i32 = arith.constant 0 : i32
    %c0_i32_0 = arith.constant 0 : i32
    return %arg0, %arg2, %c0_i32 : i32, i32, i32
  }
  func.func @transform_2(%arg0: i32, %arg1: i32, %arg2: i32) -> (i32, i32, i32) {
    %c0_i32 = arith.constant 0 : i32
    %c0_i32_0 = arith.constant 0 : i32
    return %arg0, %arg2, %c0_i32 : i32, i32, i32
  }
  func.func @transform_3(%arg0: i32, %arg1: i32, %arg2: i32) -> (i32, i32, i32) {
    %c0_i32 = arith.constant 0 : i32
    %c0_i32_0 = arith.constant 0 : i32
    return %arg0, %arg1, %c0_i32 : i32, i32, i32
  }
  func.func @transform_4(%arg0: i32, %arg1: i32, %arg2: i32) -> (i32, i32, i32) {
    %c0_i32 = arith.constant 0 : i32
    %c0_i32_0 = arith.constant 0 : i32
    return %arg0, %arg1, %c0_i32 : i32, i32, i32
  }
}

</mosaic_0001>

<bundles_post_ra>
// kernel: tpu_custom_call.1
= control target key start
LH: loop header
LB: loop body
LE: loop exit
PB: predicated region body
PF: predicated region fallthrough
CT: control target
= control target key end

     0   :  { %9 = vsyncpa [#allocation7], 0  ;;  %s438_s0 = inlined_call_operand.vmem [shape: f32[1,8,16], index: 0, kind: input, shape index: {}]   ;;  %s439_s1 = inlined_call_operand.hbm [shape: f32[1,8,16], index: 1, kind: input, shape index: {}]   ;;  %s440_s2 = inlined_call_operand.hbm [shape: f32[1,8,16], index: 2, kind: input, shape index: {}]   ;;  %s441_s3 = inlined_call_operand.vmem [shape: f32[1,8,1], index: 3, kind: input, shape index: {}]   ;;  %s442_s4 = inlined_call_operand.hbm [shape: f32[1,8,16], index: 4, kind: output, shape index: {}]  }
   0x1   :  { %10 = vsyncpa [#allocation10], 0 }
   0x2   :  { %11 = vsyncpa [#allocation8], 0  ;;  %s378_s15 = smov [#allocation6]   ;;  %s379_s17 = smov [#allocation9]  }
   0x3   :  { %s20_s16 = sshll.u32 %s378_s15, 4  ;;  %s30_s18 = sshll.u32 %s379_s17, 4  ;;  %s21_s16 = int_to_ptr.vmem [resolvable:$true] %s20_s16  ;;  %s31_s18 = int_to_ptr.vmem [resolvable:$true] %s30_s18 }
   0x4   :  { %s320_s19 = scalar_lea.vmem %s21_s16, 128  ;;  %p325_p1 = scmp.lt.s32.totalorder %s21_s16, %s21_s16 }
   0x5   :  { %p321_p0 = scmp.ne.s32.totalorder %s21_s16, %s320_s19  ;;  %p326_p2 = scmp.lt.s32.totalorder %s320_s19, %s320_s19 }
   0x7   :  { %p327_p3 = por %p326_p2, %p325_p1 }
   0x9   :  { %p328_p4 = pnand %p327_p3, %p321_p0 }
   0xb   :  { %331 = shalt.err (!%p328_p4)
}
   0xc   :  { %23 = dma.hbm_to_vmem [thread:$0]  %s439_s1, 128, %s21_s16, [#allocation7]  }
   0xd   :  { %s340_s22 = scalar_lea.vmem %s31_s18, 128  ;;  %p345_p6 = scmp.lt.s32.totalorder %s31_s18, %s31_s18 }
   0xe   :  { %p341_p5 = scmp.ne.s32.totalorder %s31_s18, %s340_s22  ;;  %p346_p7 = scmp.lt.s32.totalorder %s340_s22, %s340_s22 }
  0x10   :  { %p347_p8 = por %p346_p7, %p345_p6 }
  0x12   :  { %p348_p9 = pnand %p347_p8, %p341_p5 }
  0x14   :  { %351 = shalt.err (!%p348_p9)
}
  0x15   :  { %33 = dma.hbm_to_vmem [thread:$0]  %s440_s2, 128, %s31_s18, [#allocation10]  }
  0x16   :  { %372 = dma.done.wait [#allocation7], 128  }
  0x17   :  { %373 = vsyncadd [#allocation7], 4294967168 }
  0x18   :  { %374 = dma.done.wait [#allocation10], 128  }
  0x19   :  { %375 = vsyncadd [#allocation10], 4294967168  ;;  %v380_v0 = vmov 0   ;;  %v51_v1 = vld [vmem:[%s441_s3] sm:$0xff]  ;;  %vm49_vm0 = vcmask 130048   ;;  %v381_v4 = vmov 0.0  }
  0x1a   :  { %302 = vset.pattern.permute.xlu0 %v380_v0  ;;  %303 = vset.pattern.permute.xlu1 %v380_v0  ;;  %304 = vrcp.f32 %v51_v1  ;;  %v65_v2 = vld [vmem:[#allocation6] sm:$0xff]  ;;  %50 = vst.msk [vmem:[#allocation5] sm:$0xff] %vm49_vm0, %v381_v4  ;;  %vm382_vm1 = vmmov 0   ;;  %vm46_vm2 = vcmask 7168   ;;  %v383_v9 = vmov -inf   ;;  %v66_v17 = vld [vmem:[#allocation9] sm:$0xff] }
  0x1b   :  { %285 = vmatprep.subr.mxu0 %v381_v4  ;;  %287 = vmatprep.mubr.msk.f32.mxu0 %vm382_vm1, %v381_v4  ;;  %v53_v5 = vld [vmem:[%s438_s0] sm:$0xff]  ;;  %47 = vst.msk [vmem:[#allocation3] sm:$0xff] %vm46_vm2, %v383_v9  ;;  %48 = vst.msk [vmem:[#allocation4] sm:$0xff] %vm46_vm2, %v381_v4  ;;  %vm144_vm3 = vcmask 64512   ;;  %s384_s0 = smov [#allocation11]  }
  0x1c   :  { %286 = vmatpush3.xpose.msk.msra.mxu0 %vm49_vm0, %v65_v2  ;;  %290 = vmatprep.subr.mxu1 %v381_v4  ;;  %s268_s3 = sshll.u32 %s384_s0, 4  ;;  %s269_s3 = int_to_ptr.vmem [resolvable:$true] %s268_s3 }
  0x1d   :  { %292 = vmatprep.mubr.msk.f32.mxu1 %vm382_vm1, %v381_v4  ;;  %291 = vmatpush3.msra.mxu1 %v66_v17  ;;  %s352_s27 = scalar_lea.vmem %s269_s3, 128  ;;  %p357_p11 = scmp.lt.s32.totalorder %s269_s3, %s269_s3 }
  0x1e   :  { %p353_p10 = scmp.ne.s32.totalorder %s269_s3, %s352_s27  ;;  %p358_p12 = scmp.lt.s32.totalorder %s352_s27, %s352_s27 }
  0x20   :  { %p359_p13 = por %p358_p12, %p357_p11 }
  0x21   :  { %v64_v31 = vld [vmem:[#allocation5] sm:$0xff] }
  0x22   :  { %v62_v13 = vld [vmem:[#allocation3] sm:$0xff]  ;;  %v63_v25 = vld [vmem:[#allocation4] sm:$0xff]  ;;  %p360_p0 = pnand %p359_p13, %p353_p10 }
  0x27   :  { %v305_v3 = vpop.eup %304 }
  0x28   :  { %56 = vperm.xlu0 %302, %v305_v3  }
  0xa3   :  { %v57_v6 = vpop.permute.xlu0 %56 }
  0xa4   :  { %v59_v7 = vmul.f32 %v57_v6, %v53_v5 }
  0xa6   :  { %60 = vst.msk [vmem:[#allocation2] sm:$0xff] %vm49_vm0, %v59_v7 }
  0xad   :  { %v61_v8 = vld [vmem:[#allocation2] sm:$0xff] }
  0xae   :  { %288 = vmatmul.mubr.msk.f32.vlgmr.msra.gmra.mxu0 %vm49_vm0, %v61_v8 }
 0x16e   :  { %v140_v10 = vpop.f32.mrf.mxu0 }
 0x16f   :  { %v145_v11 = vsel %vm144_vm3, %v140_v10, -inf }
 0x170   :  { %146 = vmax.xlane.f32.xlu0 %v145_v11  ;;  %v289_v12 = vpop.f32.mrf.mxu0 }
 0x1f9   :  { %v147_v14 = vpop.xlane.xlu0 %146 }
 0x1fa   :  { %v148_v15 = vmax.f32 %v62_v13, %v147_v14 }
 0x1fc   :  { %v149_v16 = vsub.f32 %v62_v13, %v148_v15  ;;  %246 = vst.msk [vmem:[#allocation3] sm:$0xff] %vm46_vm2, %v148_v15  ;;  %154 = vperm.xlu1 %303, %v148_v15  }
 0x1fe   :  { %v150_v18 = vmul.f32 1.442695, %v149_v16 }
 0x200   :  { %306 = vpow2.f32 %v150_v18 }
 0x20d   :  { %v307_v19 = vpop.eup %306 }
 0x20e   :  { %167 = vperm.xlu0 %302, %v307_v19   ;;  %v160_v26 = vmul.f32 %v307_v19, %v63_v25 }
 0x277   :  { %v155_v20 = vpop.permute.xlu1 %154 }
 0x278   :  { %v157_v21 = vsub.f32 %v140_v10, %v155_v20 }
 0x27a   :  { %v158_v22 = vmul.f32 1.442695, %v157_v21 }
 0x27c   :  { %308 = vpow2.f32 %v158_v22 }
 0x289   :  { %v309_v23 = vpop.eup %308  ;;  %v168_v32 = vpop.permute.xlu0 %167 }
 0x28a   :  { %293 = vmatmul.mubr.msk.f32.vlgmr.msra.gmra.mxu1 %vm144_vm3, %v309_v23  ;;  %v161_v24 = vsel %vm144_vm3, %v309_v23, 0.0  ;;  %v170_v33 = vmul.f32 %v168_v32, %v64_v31 }
 0x28b   :  { %162 = vadd.xlane.f32.xlu1 %v161_v24 }
 0x314   :  { %v163_v27 = vpop.xlane.xlu1 %162 }
 0x315   :  { %v164_v28 = vadd.f32 %v163_v27, %v160_v26 }
 0x317   :  { %247 = vst.msk [vmem:[#allocation4] sm:$0xff] %vm46_vm2, %v164_v28 }
 0x31e   :  { %v253_v29 = vld [vmem:[#allocation4] sm:$0xff] }
 0x31f   :  { %310 = vrcp.f32 %v253_v29 }
 0x32c   :  { %v311_v30 = vpop.eup %310 }
 0x32d   :  { %257 = vperm.xlu1 %303, %v311_v30  }
 0x34a   :  { %v240_v34 = vpop.f32.mrf.mxu1 }
 0x34b   :  { %v244_v35 = vadd.f32 %v240_v34, %v170_v33 }
 0x34c   :  { %v294_v36 = vpop.f32.mrf.mxu1 }
 0x34d   :  { %248 = vst.msk [vmem:[#allocation5] sm:$0xff] %vm49_vm0, %v244_v35 }
 0x354   :  { %v252_v37 = vld [vmem:[#allocation5] sm:$0xff] }
 0x3a8   :  { %v258_v38 = vpop.permute.xlu1 %257 }
 0x3a9   :  { %v260_v39 = vmul.f32 %v258_v38, %v252_v37 }
 0x3ab   :  { %261 = vst.msk [vmem:[#allocation11] sm:$0xff] %vm49_vm0, %v260_v39 }
 0x3ac   :  { %363 = shalt.err (!%p360_p0)
}
 0x3ad   :  { %271 = dma.vmem_to_hbm [thread:$0]  %s269_s3, 128, %s442_s4, [#allocation8]  }
 0x3ae   :  { %376 = dma.done.wait [#allocation8], 128  }
 0x3af   :  { %377 = vsyncadd [#allocation8], 4294967168 }
 0x3b0   :  { %275 = vsyncpa [#allocation7], 1 }
 0x3b1   :  { %276 = vsyncpa [#allocation10], 1 }
 0x3b2   :  { %277 = vsyncpa [#allocation8], 1 }

</bundles_post_ra>
